<compile_context>
chip_gen: v7x
topology: tpu7x:2x2x1
jax: 0.10.0
libtpu: 0.0.40
codegen_flags: <defaults>
</compile_context>

<pallas_src>
import functools

import jax
import jax.numpy as jnp
from jax import lax
from jax.experimental import pallas as pl
from jax.experimental.pallas import tpu as pltpu


# ----------------------------------------------------------------------------
# Hardware-aware sizing helpers
# ----------------------------------------------------------------------------
_MIB = 1024 * 1024


def _round_up(x: int, m: int) -> int:
    return (x + m - 1) // m * m


def _vmem_capacity_bytes() -> int:
    """Per-TensorCore VMEM capacity; conservative 64 MiB (v7x) fallback."""
    try:
        cap = getattr(pltpu.get_tpu_info(), "vmem_capacity_bytes", None)
        if cap:
            return int(cap)
    except Exception:
        pass
    return 64 * _MIB


def _budgets():
    cap = _vmem_capacity_bytes()
    per_buffer = 8 * _MIB if cap <= 64 * _MIB else 20 * _MIB
    ceiling = cap - 16 * _MIB          # headroom for Mosaic internal scratch
    return per_buffer, ceiling


def _vmem_limit(needed: int, ceiling: int) -> int:
    return int(max(16 * _MIB, min(ceiling, needed + 8 * _MIB)))


def _choose_tk(ab: int, cd: int, itemsize: int, per_buffer_budget: int) -> int:
    """MXU-friendly K tile (multiple of 256) sized so one double-buffered
    (ab, tk) feature slab fits the per-generation DMA budget, and capped so
    the K grid keeps >= ~4 steps of DMA/compute overlap."""
    if cd <= 256:
        return cd                                    # single full-width tile
    tk = per_buffer_budget // max(1, ab * itemsize)
    tk = (tk // 256) * 256
    if tk > 0:
        tk = min(tk, _round_up(pl.cdiv(cd, 4), 256))
    tk = max(tk, 256)
    return cd if tk >= cd else tk


def _prep_features(x):
    """Flatten NCHW -> (a*b, c*d) in native dtype. No pad, no astype."""
    a, b, c, d = x.shape
    ab, cd = a * b, c * d
    return x.reshape(ab, cd), ab, cd


# ----------------------------------------------------------------------------
# Kernel bodies
# ----------------------------------------------------------------------------
def _accumulate_partial_gram(acc_ref, f):
    # Contract the lane (last) dim of BOTH operands: F_k @ F_k^T with f32 MXU
    # accumulation, without materializing a transposed copy in the wrapper.
    # (tk is kept moderate so any Mosaic-internal operand transpose hides
    # under the feature-tile DMA.)
    acc_ref[...] += lax.dot_general(
        f, f,
        dimension_numbers=(((1,), (1,)), ((), ())),
        preferred_element_type=jnp.float32)


def _accumulate_step(feat_ref, acc_ref, *, cd, tk):
    """One K step: accumulate F_k @ F_k^T.  When cd % tk != 0 the final grid
    step gets a partial block whose out-of-bounds lanes are undefined, so they
    are masked to zero before the dot (zeros are neutral for F @ F^T)."""
    k = pl.program_id(0)
    n_k = pl.num_programs(0)
    rem = cd % tk                                    # static Python int

    if rem == 0:
        _accumulate_partial_gram(acc_ref, feat_ref[...])
    else:
        @pl.when(k != n_k - 1)
        def _full_tile():
            _accumulate_partial_gram(acc_ref, feat_ref[...])

        @pl.when(k == n_k - 1)
        def _ragged_tile():
            f = feat_ref[...]
            col = lax.broadcasted_iota(jnp.int32, f.shape, 1)
            _accumulate_partial_gram(
                acc_ref, jnp.where(col < rem, f, jnp.zeros_like(f)))


def _gram_kernel(feat_ref, gram_ref, acc_ref, *, inv_norm, cd, tk):
    @pl.when(pl.program_id(0) == 0)
    def _init():
        acc_ref[...] = jnp.zeros_like(acc_ref)

    _accumulate_step(feat_ref, acc_ref, cd=cd, tk=tk)

    @pl.when(pl.program_id(0) == pl.num_programs(0) - 1)
    def _finalize():
        gram_ref[...] = acc_ref[...] * jnp.float32(inv_norm)


def _style_loss_kernel(feat_ref, target_ref, loss_ref, acc_ref,
                       *, inv_norm, inv_mse_count, cd, tk):
    @pl.when(pl.program_id(0) == 0)
    def _init():
        acc_ref[...] = jnp.zeros_like(acc_ref)

    _accumulate_step(feat_ref, acc_ref, cd=cd, tk=tk)

    @pl.when(pl.program_id(0) == pl.num_programs(0) - 1)
    def _finalize():
        g = acc_ref[...] * jnp.float32(inv_norm)
        diff = g - target_ref[...]
        # mse_loss(G, target), reduction='mean' over the (a*b)^2 entries.
        loss_ref[0, 0] = jnp.sum(diff * diff) * jnp.float32(inv_mse_count)


# ----------------------------------------------------------------------------
# Wrappers
# ----------------------------------------------------------------------------
def gram_matrix(x):
    """G = (F @ F^T) / (a*b*c*d) with F = x.view(a*b, c*d) — mirrors PyTorch."""
    feats, ab, cd = _prep_features(x)
    itemsize = feats.dtype.itemsize
    per_buffer, ceiling = _budgets()
    tk = _choose_tk(ab, cd, itemsize, per_buffer)
    n_k = pl.cdiv(cd, tk)

    needed = 2 * ab * tk * itemsize + 3 * ab * ab * 4   # feat dbl-buf + out + acc
    if needed > ceiling:
        # TODO(synk): 2-D (M, N) output-tiled, symmetry-aware Gram variant for
        # very large a*b where the resident (ab, ab) accumulator exceeds VMEM.
        raise NotImplementedError(
            f"a*b={ab} too large for the resident-accumulator Gram kernel")

    kernel = functools.partial(_gram_kernel, inv_norm=1.0 / (ab * cd),
                               cd=cd, tk=tk)
    return pl.pallas_call(
        kernel,
        out_shape=jax.ShapeDtypeStruct((ab, ab), jnp.float32),
        grid_spec=pltpu.PrefetchScalarGridSpec(
            num_scalar_prefetch=0,
            grid=(n_k,),
            in_specs=[pl.BlockSpec((ab, tk), lambda k: (0, k))],
            out_specs=pl.BlockSpec((ab, ab), lambda k: (0, 0)),
            scratch_shapes=[pltpu.VMEM((ab, ab), jnp.float32)],
        ),
        compiler_params=pltpu.CompilerParams(
            dimension_semantics=("arbitrary",),
            vmem_limit_bytes=_vmem_limit(needed, ceiling),
        ),
        cost_estimate=pl.CostEstimate(
            flops=2 * ab * ab * cd,
            transcendentals=0,
            bytes_accessed=ab * cd * itemsize + ab * ab * 4,
        ),
    )(feats)


class StyleLoss:
    """JAX/Pallas port of the PyTorch StyleLoss module.

    __init__ stores the Gram matrix of the target feature map ("detached" by
    construction — it is just a computed array).  forward(x) computes the MSE
    between gram_matrix(x) and the target, stashes it in self.loss, and
    returns x unchanged, mirroring the PyTorch semantics.
    """

    def __init__(self, target_feature):
        self.target = gram_matrix(target_feature)     # (a*b, a*b) float32

    def forward(self, x):
        feats, ab, cd = _prep_features(x)
        assert self.target.shape == (ab, ab), (
            "input and target feature maps must share (batch, channel) dims")
        itemsize = feats.dtype.itemsize
        per_buffer, ceiling = _budgets()
        tk = _choose_tk(ab, cd, itemsize, per_buffer)
        n_k = pl.cdiv(cd, tk)

        # feat dbl-buf + resident target (dbl-buf) + f32 accumulator scratch
        needed = 2 * ab * tk * itemsize + 3 * ab * ab * 4
        if needed > ceiling:
            # TODO(synk): 2-D tiled / symmetric variant for very large a*b.
            raise NotImplementedError(
                f"a*b={ab} too large for the resident-accumulator loss kernel")

        kernel = functools.partial(
            _style_loss_kernel,
            inv_norm=1.0 / (ab * cd),
            inv_mse_count=1.0 / (ab * ab),
            cd=cd, tk=tk)

        loss = pl.pallas_call(
            kernel,
            out_shape=jax.ShapeDtypeStruct((1, 1), jnp.float32),
            grid_spec=pltpu.PrefetchScalarGridSpec(
                num_scalar_prefetch=0,
                grid=(n_k,),
                in_specs=[
                    pl.BlockSpec((ab, tk), lambda k: (0, k)),
                    # Target Gram: constant block index => DMA'd once, resident.
                    pl.BlockSpec((ab, ab), lambda k: (0, 0)),
                ],
                # Only output is the scalar loss, in SMEM (no Gram HBM
                # writeback, no masked (1,1) VMEM vector store).
                out_specs=pl.BlockSpec(memory_space=pltpu.MemorySpace.SMEM),
                scratch_shapes=[pltpu.VMEM((ab, ab), jnp.float32)],
            ),
            compiler_params=pltpu.CompilerParams(
                dimension_semantics=("arbitrary",),
                vmem_limit_bytes=_vmem_limit(needed, ceiling),
            ),
            cost_estimate=pl.CostEstimate(
                flops=2 * ab * ab * cd,
                transcendentals=0,
                bytes_accessed=ab * cd * itemsize + 2 * ab * ab * 4,
            ),
        )(feats, self.target)

        self.loss = loss[0, 0]
        return x                          # forward returns the input untouched

    __call__ = forward


# ----------------------------------------------------------------------------
# Reference (plain JAX) for validation
# ----------------------------------------------------------------------------
def _gram_ref(x):
    a, b, c, d = x.shape
    f = x.reshape(a * b, c * d).astype(jnp.float32)
    return (f @ f.T) / (a * b * c * d)


# ----------------------------------------------------------------------------
if __name__ == "__main__":
    key = jax.random.PRNGKey(0)
    k_t, k_x, k_r = jax.random.split(key, 3)

    # Shapes consistent with the module: NCHW, batch=2, channels=4, 16x16
    # -> features matrix (a*b, c*d) = (8, 256), Gram = (8, 8)
    target_feature = jax.random.normal(k_t, (2, 4, 16, 16), dtype=jnp.float32)
    x = jax.random.normal(k_x, (2, 4, 16, 16), dtype=jnp.float32)

    module = StyleLoss(target_feature)
    out = module(x)

    out = jax.block_until_ready(out)
    loss = jax.block_until_ready(module.loss)

    # Correctness checks against the pure-JAX reference.
    ref_target = _gram_ref(target_feature)
    ref_gram = _gram_ref(x)
    ref_loss = jnp.mean((ref_gram - ref_target) ** 2)

    assert out.shape == x.shape and jnp.allclose(out, x), \
        "forward must return input unchanged"
    assert jnp.allclose(module.target, ref_target, atol=1e-5, rtol=1e-5), \
        "target gram mismatch"
    assert jnp.allclose(gram_matrix(x), ref_gram, atol=1e-5, rtol=1e-5), \
        "gram mismatch"
    assert jnp.allclose(loss, ref_loss, atol=1e-5, rtol=1e-5), \
        "loss mismatch"

    # Ragged-K + bf16 path: c*d = 300 is not a multiple of the 256 K tile, so
    # the in-kernel tail mask is exercised; bf16 features exercise the
    # half-HBM-traffic path (accumulation stays f32 on the MXU).
    xr = jax.random.normal(k_r, (1, 8, 15, 20),
                           dtype=jnp.float32).astype(jnp.bfloat16)
    g_ragged = jax.block_until_ready(gram_matrix(xr))
    ref_ragged = _gram_ref(xr.astype(jnp.float32))
    assert jnp.allclose(g_ragged, ref_ragged, atol=1e-4, rtol=1e-4), \
        "ragged/bf16 gram mismatch"

    print("KERNEL_OK")
</pallas_src>

<mosaic_0001>
module attributes {stable_mosaic.version = 11 : i64} {
  func.func @_gram_kernel(%arg0: i32, %arg1: memref<8x256xf32, #tpu.memory_space<vmem>>, %arg2: memref<8x8xf32, #tpu.memory_space<vmem>>, %arg3: memref<8x8xf32, #tpu.memory_space<vmem>>) attributes {dimension_semantics = [#tpu.dimension_semantics<arbitrary>], iteration_bounds = array<i64: 1>, scalar_prefetch = 0 : i64, scratch_operands = 1 : i64, tpu.core_type = #tpu.core_type<tc>, window_params = [{transform_indices = @transform_0, window_bounds = array<i64: 8, 256>}, {pipeline_mode = #tpu.pipeline_mode<synchronous>, transform_indices = @transform_1, window_bounds = array<i64: 8, 8>}]} {
    %c0_i32 = arith.constant 0 : i32
    %0 = arith.cmpi eq, %arg0, %c0_i32 : i32
    %1 = arith.extui %0 : i1 to i32
    %c0_i32_0 = arith.constant 0 : i32
    %2 = arith.cmpi ne, %1, %c0_i32_0 : i32
    scf.if %2 {
      %cst_8 = arith.constant 0.000000e+00 : f32
      %11 = vector.broadcast %cst_8 : f32 to vector<8x8xf32>
      %c0_9 = arith.constant 0 : index
      %c0_10 = arith.constant 0 : index
      %12 = vector.load %arg3[%c0_9, %c0_10] : memref<8x8xf32, #tpu.memory_space<vmem>>, vector<8x8xf32>
      tpu.vector_store %arg3[%c0_9, %c0_10], %11 {strides = array<i32>} : memref<8x8xf32, #tpu.memory_space<vmem>>, vector<8x8xf32>,
    } else {
    }
    %c0 = arith.constant 0 : index
    %c0_1 = arith.constant 0 : index
    %3 = vector.load %arg1[%c0, %c0_1] : memref<8x256xf32, #tpu.memory_space<vmem>>, vector<8x256xf32>
    %c0_2 = arith.constant 0 : index
    %c0_3 = arith.constant 0 : index
    %4 = vector.load %arg3[%c0_2, %c0_3] : memref<8x8xf32, #tpu.memory_space<vmem>>, vector<8x8xf32>
    %cst = arith.constant dense<0.000000e+00> : vector<8x8xf32>
    %5 = tpu.matmul %3, %3, %cst {dimension_numbers = #tpu.dot_dimension_numbers<[1], [1], [0], [0], [0, 0, 1, 0], [], []>} : vector<8x256xf32>, vector<8x256xf32>, vector<8x8xf32> -> vector<8x8xf32>
    %6 = arith.addf %4, %5 : vector<8x8xf32>
    %c0_4 = arith.constant 0 : index
    %c0_5 = arith.constant 0 : index
    %7 = vector.load %arg3[%c0_4, %c0_5] : memref<8x8xf32, #tpu.memory_space<vmem>>, vector<8x8xf32>
    tpu.vector_store %arg3[%c0_4, %c0_5], %6 {strides = array<i32>} : memref<8x8xf32, #tpu.memory_space<vmem>>, vector<8x8xf32>,
    %c0_i32_6 = arith.constant 0 : i32
    %8 = arith.cmpi eq, %arg0, %c0_i32_6 : i32
    %9 = arith.extui %8 : i1 to i32
    %c0_i32_7 = arith.constant 0 : i32
    %10 = arith.cmpi ne, %9, %c0_i32_7 : i32
    scf.if %10 {
      %c0_8 = arith.constant 0 : index
      %c0_9 = arith.constant 0 : index
      %11 = vector.load %arg3[%c0_8, %c0_9] : memref<8x8xf32, #tpu.memory_space<vmem>>, vector<8x8xf32>
      %cst_10 = arith.constant 4.8828125E-4 : f32
      %12 = vector.broadcast %cst_10 : f32 to vector<8x8xf32>
      %13 = arith.mulf %11, %12 : vector<8x8xf32>
      %c0_11 = arith.constant 0 : index
      %c0_12 = arith.constant 0 : index
      %14 = vector.load %arg2[%c0_11, %c0_12] : memref<8x8xf32, #tpu.memory_space<vmem>>, vector<8x8xf32>
      tpu.vector_store %arg2[%c0_11, %c0_12], %13 {strides = array<i32>} : memref<8x8xf32, #tpu.memory_space<vmem>>, vector<8x8xf32>,
    } else {
    }
    return
  }
  func.func @transform_0(%arg0: i32) -> (i32, i32) {
    %c0_i32 = arith.constant 0 : i32
    %c0_i32_0 = arith.constant 0 : i32
    return %c0_i32, %arg0 : i32, i32
  }
  func.func @transform_1(%arg0: i32) -> (i32, i32) {
    %c0_i32 = arith.constant 0 : i32
    %c0_i32_0 = arith.constant 0 : i32
    %c0_i32_1 = arith.constant 0 : i32
    return %c0_i32, %c0_i32_0 : i32, i32
  }
}

</mosaic_0001>

<bundles_post_ra>
// kernel: tpu_custom_call.1
= control target key start
LH: loop header
LB: loop body
LE: loop exit
PB: predicated region body
PF: predicated region fallthrough
CT: control target
= control target key end

     0   :  { %6 = vsyncpa [#allocation4], 0  ;;  %s215_s0 = inlined_call_operand.hbm [shape: f32[8,256], index: 0, kind: input, shape index: {}]   ;;  %s216_s1 = inlined_call_operand.hbm [shape: f32[8,8], index: 1, kind: output, shape index: {}]  }
   0x1   :  { %7 = vsyncpa [#allocation5], 0  ;;  %s175_s6 = smov [#allocation3]   ;;  %s127_s10 = scalar_lea.hbm %s215_s0, 256 }
   0x2   :  { %s14_s7 = sshll.u32 %s175_s6, 4  ;;  %p128_p0 = scmp.ne.s32.totalorder %s215_s0, %s127_s10  ;;  %s15_s7 = int_to_ptr.vmem [resolvable:$true] %s14_s7 }
   0x3   :  { %p131_p1 = scmp.lt.u32.totalorder %s127_s10, %s215_s0 }
   0x5   :  { %p133_p2 = pnand %p131_p1, %p128_p0 }
   0x7   :  { %136 = shalt.err (!%p133_p2)
}
   0x8   :  { %s137_s15 = scalar_lea.vmem %s15_s7, 256  ;;  %p142_p4 = scmp.lt.s32.totalorder %s15_s7, %s15_s7 }
   0x9   :  { %p138_p3 = scmp.ne.s32.totalorder %s15_s7, %s137_s15  ;;  %p143_p5 = scmp.lt.s32.totalorder %s137_s15, %s137_s15 }
   0xb   :  { %p144_p6 = por %p143_p5, %p142_p4 }
   0xd   :  { %p145_p7 = pnand %p144_p6, %p138_p3 }
   0xf   :  { %148 = shalt.err (!%p145_p7)
}
  0x10   :  { %17 = dma.hbm_to_vmem [thread:$0]  %s215_s0, 256, %s15_s7, [#allocation4]  }
  0x11   :  { %171 = dma.done.wait [#allocation4], 256  }
  0x12   :  { %172 = vsyncadd [#allocation4], 4294967040  ;;  %vm25_vm0 = vcmask 64512   ;;  %v176_v0 = vmov 0.0   ;;  %v28_v1 = vld [vmem:[#allocation3 + $0x8] sm:$0xff]  ;;  %v27_v2 = vld [vmem:[#allocation3] sm:$0xff] }
  0x13   :  { %26 = vst.msk [vmem:[#allocation2] sm:$0xff] %vm25_vm0, %v176_v0  ;;  %30 = vmatprep.subr.mxu0 %v28_v1  ;;  %94 = vmatprep.mubr.f32.mxu0 %v28_v1  ;;  %s177_s18 = smov [#allocation6]  }
  0x14   :  { %31 = vmatpush1.xpose.msra.mxu0 %v27_v2  ;;  %s115_s0 = sshll.u32 %s177_s18, 4  ;;  %s116_s0 = int_to_ptr.vmem [resolvable:$true] %s115_s0 }
  0x15   :  { %s149_s19 = scalar_lea.vmem %s116_s0, 128  ;;  %p154_p9 = scmp.lt.s32.totalorder %s116_s0, %s116_s0 }
  0x16   :  { %p150_p8 = scmp.ne.s32.totalorder %s116_s0, %s149_s19  ;;  %p155_p10 = scmp.lt.s32.totalorder %s149_s19, %s149_s19 }
  0x17   :  { %95 = vmatmul.mubr.f32.vlgmr.msra.gmra.mrb[0].mxu0 %v27_v2 }
  0x18   :  { %p156_p11 = por %p155_p10, %p154_p9 }
  0x1a   :  { %v29_v3 = vld [vmem:[#allocation2] sm:$0xff]  ;;  %p157_p12 = pnand %p156_p11, %p150_p8 }
  0xea   :  { %v96_v4 = vpop.f32.mrb[0].mxu0 }
  0xeb   :  { %v100_v5 = vadd.f32 %v96_v4, %v29_v3  ;;  %v98_v6 = vpop.f32.mrb[1].mxu0 }
  0xed   :  { %102 = vst.msk [vmem:[#allocation2] sm:$0xff] %vm25_vm0, %v100_v5 }
  0xf4   :  { %v106_v7 = vld [vmem:[#allocation2] sm:$0xff] }
  0xf5   :  { %v107_v8 = vmul.f32 0.00048828125, %v106_v7 }
  0xf7   :  { %108 = vst.msk [vmem:[#allocation6] sm:$0xff] %vm25_vm0, %v107_v8 }
  0xf8   :  { %160 = shalt.err (!%p157_p12)
}
  0xf9   :  { %s161_s22 = scalar_lea.hbm %s216_s1, 128 }
  0xfa   :  { %p162_p13 = scmp.ne.s32.totalorder %s216_s1, %s161_s22  ;;  %p165_p0 = scmp.lt.u32.totalorder %s161_s22, %s216_s1 }
  0xfc   :  { %p167_p1 = pnand %p165_p0, %p162_p13 }
  0xfe   :  { %170 = shalt.err (!%p167_p1)
}
  0xff   :  { %118 = dma.vmem_to_hbm [thread:$0]  %s116_s0, 128, %s216_s1, [#allocation5]  }
 0x100   :  { %173 = dma.done.wait [#allocation5], 128  }
 0x101   :  { %174 = vsyncadd [#allocation5], 4294967168 }
 0x102   :  { %122 = vsyncpa [#allocation4], 1 }
 0x103   :  { %123 = vsyncpa [#allocation5], 1 }

</bundles_post_ra>
